<compile_context>
chip_gen: v6e
topology: v6e:2x2x1
jax: 0.10.0
libtpu: 0.0.40
codegen_flags: <defaults>
</compile_context>

<pallas_src>
import jax
import jax.numpy as jnp
from jax.experimental import pallas as pl
from jax.experimental.pallas import tpu as pltpu

_LANE = 128  # TPU lane width


# ---------------------------------------------------------------------------
# Kernel
# ---------------------------------------------------------------------------
def _fuse_kernel(orig_ref, i1_ref, i2_ref, i3_ref, fmask_ref,
                 wa_ref, wb_ref, wc_ref, we_ref, bb_ref, be_ref, out_ref):
    f32 = jnp.float32
    bf16 = jnp.bfloat16

    orig = orig_ref[...]                       # (tm, H) f32
    orig_b = orig.astype(bf16)                 # shared bf16 copy, hoisted once
    xs = (i1_ref[...], i2_ref[...], i3_ref[...])

    # expert score, lane-padded to 128 (lanes >= 3 hold -1e9 via be_ref padding)
    score = fmask_ref[...] + be_ref[...]       # (tm, 128) f32

    for k in range(3):                          # static unroll over the 3 branches
        x = xs[k]
        # pre = cat([orig, x, orig-x, orig*x]) @ W_k.T + b_k   (weights pre-folded)
        pre = (jnp.dot(orig_b, wa_ref[k], preferred_element_type=f32)
               + jnp.dot(x.astype(bf16), wb_ref[k], preferred_element_type=f32)
               + jnp.dot((orig * x).astype(bf16), wc_ref[k],
                         preferred_element_type=f32)
               + bb_ref[k])                     # (1, H) bias, f32
        out_k = jnp.maximum(pre, 0.0)           # ReLU, f32
        # expert contribution of branch k (lane-padded weight columns are zero)
        score = score + jnp.dot(out_k.astype(bf16), we_ref[k],
                                preferred_element_type=f32)

    # softmax over the 128 lanes == softmax over the 3 real experts
    m = jnp.max(score, axis=-1, keepdims=True)
    e = jnp.exp(score - m)                      # pad lanes underflow to exactly 0
    p = e / jnp.sum(e, axis=-1, keepdims=True)  # (tm, 128)

    # sum_k input_k * prob_k (f32)
    out_ref[...] = (xs[0] * p[:, 0:1]
                    + xs[1] * p[:, 1:2]
                    + xs[2] * p[:, 2:3]).astype(out_ref.dtype)


# ---------------------------------------------------------------------------
# Host-side planning / wrapper
# ---------------------------------------------------------------------------
def _round_up(x, m):
    return (x + m - 1) // m * m


def _plan(M, H, tm=None, budget_bytes=40 << 20):
    """Pick the row tile and an explicit VMEM limit from the actual footprint."""
    # Resident (single-buffered) weights + biases: 9 HxH bf16, 3 Hx128 bf16, f32 biases.
    w_bytes = (9 * H * H) * 2 + (3 * H * _LANE) * 2 + (3 * H) * 4 + _LANE * 4

    def io_bytes(t):
        # double-buffered blocked operands: 4 inputs + 1 output (t,H) f32 + mask (t,128) f32
        return 2 * (5 * t * H + t * _LANE) * 4

    if tm is None:
        tm = min(512, _round_up(M, 8))
        while tm > 8 and w_bytes + io_bytes(tm) > budget_bytes:
            tm = max(8, _round_up(tm // 2, 8))

    vmem_limit = int(min(max(w_bytes + io_bytes(tm) + (8 << 20), 32 << 20), 56 << 20))
    return tm, vmem_limit


def fuse_layer(orig, input1, input2, input3, fusion_masks, kparams, *, tm=None):
    B, S, H = orig.shape
    M = B * S
    tm, vmem_limit = _plan(M, H, tm=tm)
    Mp = _round_up(M, tm)                      # pad rows so the grid divides evenly

    def flat(x):
        x2 = x.reshape(M, x.shape[-1])
        return jnp.pad(x2, ((0, Mp - M), (0, 0))) if Mp != M else x2

    orig2, i12, i22, i32 = flat(orig), flat(input1), flat(input2), flat(input3)
    # fusion mask: pad the 3-expert axis to a dense 128-lane slab (zeros in pad lanes)
    fm2 = jnp.pad(fusion_masks.reshape(M, 3), ((0, Mp - M), (0, _LANE - 3)))

    row_spec = pl.BlockSpec((tm, H), lambda i: (i, 0))
    mask_spec = pl.BlockSpec((tm, _LANE), lambda i: (i, 0))
    # grid-invariant weights/biases: whole array resident in VMEM, single-buffered
    resident = pl.BlockSpec(memory_space=pltpu.MemorySpace.VMEM)

    # TODO(synk): for very large H (resident weights approaching the VMEM limit),
    # tile the weight output dimension with a 2-D grid instead of full residency.
    out = pl.pallas_call(
        _fuse_kernel,
        out_shape=jax.ShapeDtypeStruct((Mp, H), jnp.float32),
        grid_spec=pltpu.PrefetchScalarGridSpec(
            num_scalar_prefetch=0,
            grid=(Mp // tm,),
            in_specs=[row_spec, row_spec, row_spec, row_spec, mask_spec,
                      resident, resident, resident, resident, resident, resident],
            out_specs=row_spec,
        ),
        compiler_params=pltpu.CompilerParams(
            dimension_semantics=("parallel",),
            vmem_limit_bytes=vmem_limit,
        ),
    )(orig2, i12, i22, i32, fm2,
      kparams["wa"], kparams["wb"], kparams["wc"],
      kparams["we"], kparams["bb"], kparams["be"])

    return out[:M].reshape(B, S, H)


# ---------------------------------------------------------------------------
# Parameters
# ---------------------------------------------------------------------------
def init_params(key, H):
    """Deterministic init mimicking nn.Linear defaults (uniform +/- 1/sqrt(fan_in))."""
    ks = jax.random.split(key, 8)

    def lin(kw, kb, in_f, out_f):
        bound = 1.0 / jnp.sqrt(in_f)
        w = jax.random.uniform(kw, (out_f, in_f), jnp.float32, -bound, bound)
        b = jax.random.uniform(kb, (out_f,), jnp.float32, -bound, bound)
        return w, b

    w1, b1 = lin(ks[0], ks[1], 4 * H, H)
    w2, b2 = lin(ks[2], ks[3], 4 * H, H)
    w3, b3 = lin(ks[4], ks[5], 4 * H, H)
    we, be = lin(ks[6], ks[7], 3 * H, 3)
    return {"w1": w1, "b1": b1, "w2": w2, "b2": b2,
            "w3": w3, "b3": b3, "we": we, "be": be}


def pack_params(params, H):
    """Fold + transpose weights for the kernel, cast matmul weights to bf16,
    lane-pad the expert path to 128."""
    def fold(w):                                # w: (H, 4H) PyTorch (out, in)
        wt = w.T                                # (4H, H)
        w_o, w_x, w_d, w_m = wt[:H], wt[H:2 * H], wt[2 * H:3 * H], wt[3 * H:]
        # cat([o, x, o-x, o*x]) @ wt == o@(w_o+w_d) + x@(w_x-w_d) + (o*x)@w_m
        return w_o + w_d, w_x - w_d, w_m

    folds = [fold(params[k]) for k in ("w1", "w2", "w3")]
    wa = jnp.stack([f[0] for f in folds]).astype(jnp.bfloat16)      # (3, H, H)
    wb = jnp.stack([f[1] for f in folds]).astype(jnp.bfloat16)      # (3, H, H)
    wc = jnp.stack([f[2] for f in folds]).astype(jnp.bfloat16)      # (3, H, H)
    bb = jnp.stack([params["b1"], params["b2"], params["b3"]])[:, None, :]  # (3,1,H) f32

    wet = params["we"].T                                            # (3H, 3)
    we_pad = jnp.zeros((3, H, _LANE), jnp.float32)
    for k in range(3):
        we_pad = we_pad.at[k, :, :3].set(wet[k * H:(k + 1) * H])
    we_pad = we_pad.astype(jnp.bfloat16)                            # (3, H, 128)
    # bias pad lanes carry -1e9 so softmax over 128 lanes == softmax over 3 experts
    be_pad = jnp.full((1, _LANE), -1e9, jnp.float32).at[0, :3].set(params["be"])

    return {"wa": wa, "wb": wb, "wc": wc, "we": we_pad, "bb": bb, "be": be_pad}


# ---------------------------------------------------------------------------
# Pure-JAX reference (exact PyTorch forward, all f32)
# ---------------------------------------------------------------------------
def fuse_layer_ref(orig, i1, i2, i3, fmask, params):
    def lin(x, w, b):
        return x @ w.T + b

    out1 = jax.nn.relu(lin(jnp.concatenate([orig, i1, orig - i1, orig * i1], -1),
                           params["w1"], params["b1"]))
    out2 = jax.nn.relu(lin(jnp.concatenate([orig, i2, orig - i2, orig * i2], -1),
                           params["w2"], params["b2"]))
    out3 = jax.nn.relu(lin(jnp.concatenate([orig, i3, orig - i3, orig * i3], -1),
                           params["w3"], params["b3"]))
    score = lin(jnp.concatenate([out1, out2, out3], -1), params["we"], params["be"]) + fmask
    prob = jax.nn.softmax(score, axis=-1)                 # (B, S, 3)
    stack = jnp.stack([i1, i2, i3], axis=-1)              # (B, S, H, 3)
    return (stack * prob[:, :, None, :]).sum(-1)


# ---------------------------------------------------------------------------
if __name__ == "__main__":
    B, S, H = 2, 8, 32
    key = jax.random.PRNGKey(0)
    k_o, k_1, k_2, k_3, k_m, k_p = jax.random.split(key, 6)

    orig = jax.random.normal(k_o, (B, S, H), jnp.float32)
    input1 = jax.random.normal(k_1, (B, S, H), jnp.float32)
    input2 = jax.random.normal(k_2, (B, S, H), jnp.float32)
    input3 = jax.random.normal(k_3, (B, S, H), jnp.float32)
    # additive mask over the 3 experts: 0 (keep) or -10000 (mask out)
    fusion_masks = jnp.where(jax.random.bernoulli(k_m, 0.25, (B, S, 3)),
                             jnp.float32(-10000.0), jnp.float32(0.0))

    params = init_params(k_p, H)
    kparams = pack_params(params, H)

    out = fuse_layer(orig, input1, input2, input3, fusion_masks, kparams)
    out = jax.block_until_ready(out)

    ref = fuse_layer_ref(orig, input1, input2, input3, fusion_masks, params)
    assert out.shape == (B, S, H)
    # bf16 MXU inputs (f32 accumulation) => looser tolerance vs the all-f32 reference.
    max_err = float(jnp.max(jnp.abs(out - ref)))
    assert jnp.allclose(out, ref, atol=7.5e-2, rtol=7.5e-2), \
        f"mismatch vs reference, max abs diff {max_err}"

    print("KERNEL_OK")
</pallas_src>

<mosaic_0001>
module attributes {stable_mosaic.version = 11 : i64} {
  func.func @_fuse_kernel(%arg0: i32, %arg1: memref<16x32xf32, #tpu.memory_space<vmem>>, %arg2: memref<16x32xf32, #tpu.memory_space<vmem>>, %arg3: memref<16x32xf32, #tpu.memory_space<vmem>>, %arg4: memref<16x32xf32, #tpu.memory_space<vmem>>, %arg5: memref<16x128xf32, #tpu.memory_space<vmem>>, %arg6: memref<3x32x32xbf16, #tpu.memory_space<vmem>>, %arg7: memref<3x32x32xbf16, #tpu.memory_space<vmem>>, %arg8: memref<3x32x32xbf16, #tpu.memory_space<vmem>>, %arg9: memref<3x32x128xbf16, #tpu.memory_space<vmem>>, %arg10: memref<3x1x32xf32, #tpu.memory_space<vmem>>, %arg11: memref<1x128xf32, #tpu.memory_space<vmem>>, %arg12: memref<16x32xf32, #tpu.memory_space<vmem>>) attributes {dimension_semantics = [#tpu.dimension_semantics<parallel>], iteration_bounds = array<i64: 1>, scalar_prefetch = 0 : i64, scratch_operands = 0 : i64, tpu.core_type = #tpu.core_type<tc>, window_params = [{transform_indices = @transform_0, window_bounds = array<i64: 16, 32>}, {transform_indices = @transform_1, window_bounds = array<i64: 16, 32>}, {transform_indices = @transform_2, window_bounds = array<i64: 16, 32>}, {transform_indices = @transform_3, window_bounds = array<i64: 16, 32>}, {transform_indices = @transform_4, window_bounds = array<i64: 16, 128>}, {pipeline_mode = #tpu.pipeline_mode<synchronous>, transform_indices = @transform_5, window_bounds = array<i64: 3, 32, 32>}, {pipeline_mode = #tpu.pipeline_mode<synchronous>, transform_indices = @transform_6, window_bounds = array<i64: 3, 32, 32>}, {pipeline_mode = #tpu.pipeline_mode<synchronous>, transform_indices = @transform_7, window_bounds = array<i64: 3, 32, 32>}, {pipeline_mode = #tpu.pipeline_mode<synchronous>, transform_indices = @transform_8, window_bounds = array<i64: 3, 32, 128>}, {pipeline_mode = #tpu.pipeline_mode<synchronous>, transform_indices = @transform_9, window_bounds = array<i64: 3, 1, 32>}, {pipeline_mode = #tpu.pipeline_mode<synchronous>, transform_indices = @transform_10, window_bounds = array<i64: 1, 128>}, {transform_indices = @transform_11, window_bounds = array<i64: 16, 32>}]} {
    %c0 = arith.constant 0 : index
    %c0_0 = arith.constant 0 : index
    %0 = vector.load %arg1[%c0, %c0_0] : memref<16x32xf32, #tpu.memory_space<vmem>>, vector<16x32xf32>
    %1 = arith.truncf %0 : vector<16x32xf32> to vector<16x32xbf16>
    %c0_1 = arith.constant 0 : index
    %c0_2 = arith.constant 0 : index
    %2 = vector.load %arg2[%c0_1, %c0_2] : memref<16x32xf32, #tpu.memory_space<vmem>>, vector<16x32xf32>
    %c0_3 = arith.constant 0 : index
    %c0_4 = arith.constant 0 : index
    %3 = vector.load %arg3[%c0_3, %c0_4] : memref<16x32xf32, #tpu.memory_space<vmem>>, vector<16x32xf32>
    %c0_5 = arith.constant 0 : index
    %c0_6 = arith.constant 0 : index
    %4 = vector.load %arg4[%c0_5, %c0_6] : memref<16x32xf32, #tpu.memory_space<vmem>>, vector<16x32xf32>
    %c0_7 = arith.constant 0 : index
    %c0_8 = arith.constant 0 : index
    %5 = vector.load %arg5[%c0_7, %c0_8] : memref<16x128xf32, #tpu.memory_space<vmem>>, vector<16x128xf32>
    %c0_9 = arith.constant 0 : index
    %c0_10 = arith.constant 0 : index
    %6 = vector.load %arg11[%c0_9, %c0_10] : memref<1x128xf32, #tpu.memory_space<vmem>>, vector<1x128xf32>
    %7 = vector.broadcast %6 : vector<1x128xf32> to vector<16x128xf32>
    %8 = arith.addf %5, %7 : vector<16x128xf32>
    %c0_11 = arith.constant 0 : index
    %c0_12 = arith.constant 0 : index
    %c0_13 = arith.constant 0 : index
    %9 = vector.load %arg6[%c0_11, %c0_12, %c0_13] : memref<3x32x32xbf16, #tpu.memory_space<vmem>>, vector<1x32x32xbf16>
    %10 = vector.shape_cast %9 : vector<1x32x32xbf16> to vector<32x32xbf16>
    %cst = arith.constant dense<0.000000e+00> : vector<16x32xf32>
    %11 = tpu.matmul %1, %10, %cst {dimension_numbers = #tpu.dot_dimension_numbers<[1], [0], [0], [1], [0, 0, 1, 1], [], []>} : vector<16x32xbf16>, vector<32x32xbf16>, vector<16x32xf32> -> vector<16x32xf32>
    %12 = arith.truncf %2 : vector<16x32xf32> to vector<16x32xbf16>
    %c0_14 = arith.constant 0 : index
    %c0_15 = arith.constant 0 : index
    %c0_16 = arith.constant 0 : index
    %13 = vector.load %arg7[%c0_14, %c0_15, %c0_16] : memref<3x32x32xbf16, #tpu.memory_space<vmem>>, vector<1x32x32xbf16>
    %14 = vector.shape_cast %13 : vector<1x32x32xbf16> to vector<32x32xbf16>
    %cst_17 = arith.constant dense<0.000000e+00> : vector<16x32xf32>
    %15 = tpu.matmul %12, %14, %cst_17 {dimension_numbers = #tpu.dot_dimension_numbers<[1], [0], [0], [1], [0, 0, 1, 1], [], []>} : vector<16x32xbf16>, vector<32x32xbf16>, vector<16x32xf32> -> vector<16x32xf32>
    %16 = arith.addf %11, %15 : vector<16x32xf32>
    %17 = arith.mulf %0, %2 : vector<16x32xf32>
    %18 = arith.truncf %17 : vector<16x32xf32> to vector<16x32xbf16>
    %c0_18 = arith.constant 0 : index
    %c0_19 = arith.constant 0 : index
    %c0_20 = arith.constant 0 : index
    %19 = vector.load %arg8[%c0_18, %c0_19, %c0_20] : memref<3x32x32xbf16, #tpu.memory_space<vmem>>, vector<1x32x32xbf16>
    %20 = vector.shape_cast %19 : vector<1x32x32xbf16> to vector<32x32xbf16>
    %cst_21 = arith.constant dense<0.000000e+00> : vector<16x32xf32>
    %21 = tpu.matmul %18, %20, %cst_21 {dimension_numbers = #tpu.dot_dimension_numbers<[1], [0], [0], [1], [0, 0, 1, 1], [], []>} : vector<16x32xbf16>, vector<32x32xbf16>, vector<16x32xf32> -> vector<16x32xf32>
    %22 = arith.addf %16, %21 : vector<16x32xf32>
    %c0_22 = arith.constant 0 : index
    %c0_23 = arith.constant 0 : index
    %c0_24 = arith.constant 0 : index
    %23 = vector.load %arg10[%c0_22, %c0_23, %c0_24] : memref<3x1x32xf32, #tpu.memory_space<vmem>>, vector<1x1x32xf32>
    %24 = vector.shape_cast %23 : vector<1x1x32xf32> to vector<1x32xf32>
    %25 = vector.broadcast %24 : vector<1x32xf32> to vector<16x32xf32>
    %26 = arith.addf %22, %25 : vector<16x32xf32>
    %cst_25 = arith.constant 0.000000e+00 : f32
    %27 = vector.broadcast %cst_25 : f32 to vector<16x32xf32>
    %28 = arith.maximumf %26, %27 : vector<16x32xf32>
    %29 = arith.truncf %28 : vector<16x32xf32> to vector<16x32xbf16>
    %c0_26 = arith.constant 0 : index
    %c0_27 = arith.constant 0 : index
    %c0_28 = arith.constant 0 : index
    %30 = vector.load %arg9[%c0_26, %c0_27, %c0_28] : memref<3x32x128xbf16, #tpu.memory_space<vmem>>, vector<1x32x128xbf16>
    %31 = vector.shape_cast %30 : vector<1x32x128xbf16> to vector<32x128xbf16>
    %cst_29 = arith.constant dense<0.000000e+00> : vector<16x128xf32>
    %32 = tpu.matmul %29, %31, %cst_29 {dimension_numbers = #tpu.dot_dimension_numbers<[1], [0], [0], [1], [0, 0, 1, 1], [], []>} : vector<16x32xbf16>, vector<32x128xbf16>, vector<16x128xf32> -> vector<16x128xf32>
    %33 = arith.addf %8, %32 : vector<16x128xf32>
    %c1 = arith.constant 1 : index
    %c0_30 = arith.constant 0 : index
    %c0_31 = arith.constant 0 : index
    %34 = vector.load %arg6[%c1, %c0_30, %c0_31] : memref<3x32x32xbf16, #tpu.memory_space<vmem>>, vector<1x32x32xbf16>
    %35 = vector.shape_cast %34 : vector<1x32x32xbf16> to vector<32x32xbf16>
    %cst_32 = arith.constant dense<0.000000e+00> : vector<16x32xf32>
    %36 = tpu.matmul %1, %35, %cst_32 {dimension_numbers = #tpu.dot_dimension_numbers<[1], [0], [0], [1], [0, 0, 1, 1], [], []>} : vector<16x32xbf16>, vector<32x32xbf16>, vector<16x32xf32> -> vector<16x32xf32>
    %37 = arith.truncf %3 : vector<16x32xf32> to vector<16x32xbf16>
    %c1_33 = arith.constant 1 : index
    %c0_34 = arith.constant 0 : index
    %c0_35 = arith.constant 0 : index
    %38 = vector.load %arg7[%c1_33, %c0_34, %c0_35] : memref<3x32x32xbf16, #tpu.memory_space<vmem>>, vector<1x32x32xbf16>
    %39 = vector.shape_cast %38 : vector<1x32x32xbf16> to vector<32x32xbf16>
    %cst_36 = arith.constant dense<0.000000e+00> : vector<16x32xf32>
    %40 = tpu.matmul %37, %39, %cst_36 {dimension_numbers = #tpu.dot_dimension_numbers<[1], [0], [0], [1], [0, 0, 1, 1], [], []>} : vector<16x32xbf16>, vector<32x32xbf16>, vector<16x32xf32> -> vector<16x32xf32>
    %41 = arith.addf %36, %40 : vector<16x32xf32>
    %42 = arith.mulf %0, %3 : vector<16x32xf32>
    %43 = arith.truncf %42 : vector<16x32xf32> to vector<16x32xbf16>
    %c1_37 = arith.constant 1 : index
    %c0_38 = arith.constant 0 : index
    %c0_39 = arith.constant 0 : index
    %44 = vector.load %arg8[%c1_37, %c0_38, %c0_39] : memref<3x32x32xbf16, #tpu.memory_space<vmem>>, vector<1x32x32xbf16>
    %45 = vector.shape_cast %44 : vector<1x32x32xbf16> to vector<32x32xbf16>
    %cst_40 = arith.constant dense<0.000000e+00> : vector<16x32xf32>
    %46 = tpu.matmul %43, %45, %cst_40 {dimension_numbers = #tpu.dot_dimension_numbers<[1], [0], [0], [1], [0, 0, 1, 1], [], []>} : vector<16x32xbf16>, vector<32x32xbf16>, vector<16x32xf32> -> vector<16x32xf32>
    %47 = arith.addf %41, %46 : vector<16x32xf32>
    %c1_41 = arith.constant 1 : index
    %c0_42 = arith.constant 0 : index
    %c0_43 = arith.constant 0 : index
    %48 = vector.load %arg10[%c1_41, %c0_42, %c0_43] : memref<3x1x32xf32, #tpu.memory_space<vmem>>, vector<1x1x32xf32>
    %49 = vector.shape_cast %48 : vector<1x1x32xf32> to vector<1x32xf32>
    %50 = vector.broadcast %49 : vector<1x32xf32> to vector<16x32xf32>
    %51 = arith.addf %47, %50 : vector<16x32xf32>
    %cst_44 = arith.constant 0.000000e+00 : f32
    %52 = vector.broadcast %cst_44 : f32 to vector<16x32xf32>
    %53 = arith.maximumf %51, %52 : vector<16x32xf32>
    %54 = arith.truncf %53 : vector<16x32xf32> to vector<16x32xbf16>
    %c1_45 = arith.constant 1 : index
    %c0_46 = arith.constant 0 : index
    %c0_47 = arith.constant 0 : index
    %55 = vector.load %arg9[%c1_45, %c0_46, %c0_47] : memref<3x32x128xbf16, #tpu.memory_space<vmem>>, vector<1x32x128xbf16>
    %56 = vector.shape_cast %55 : vector<1x32x128xbf16> to vector<32x128xbf16>
    %cst_48 = arith.constant dense<0.000000e+00> : vector<16x128xf32>
    %57 = tpu.matmul %54, %56, %cst_48 {dimension_numbers = #tpu.dot_dimension_numbers<[1], [0], [0], [1], [0, 0, 1, 1], [], []>} : vector<16x32xbf16>, vector<32x128xbf16>, vector<16x128xf32> -> vector<16x128xf32>
    %58 = arith.addf %33, %57 : vector<16x128xf32>
    %c2 = arith.constant 2 : index
    %c0_49 = arith.constant 0 : index
    %c0_50 = arith.constant 0 : index
    %59 = vector.load %arg6[%c2, %c0_49, %c0_50] : memref<3x32x32xbf16, #tpu.memory_space<vmem>>, vector<1x32x32xbf16>
    %60 = vector.shape_cast %59 : vector<1x32x32xbf16> to vector<32x32xbf16>
    %cst_51 = arith.constant dense<0.000000e+00> : vector<16x32xf32>
    %61 = tpu.matmul %1, %60, %cst_51 {dimension_numbers = #tpu.dot_dimension_numbers<[1], [0], [0], [1], [0, 0, 1, 1], [], []>} : vector<16x32xbf16>, vector<32x32xbf16>, vector<16x32xf32> -> vector<16x32xf32>
    %62 = arith.truncf %4 : vector<16x32xf32> to vector<16x32xbf16>
    %c2_52 = arith.constant 2 : index
    %c0_53 = arith.constant 0 : index
    %c0_54 = arith.constant 0 : index
    %63 = vector.load %arg7[%c2_52, %c0_53, %c0_54] : memref<3x32x32xbf16, #tpu.memory_space<vmem>>, vector<1x32x32xbf16>
    %64 = vector.shape_cast %63 : vector<1x32x32xbf16> to vector<32x32xbf16>
    %cst_55 = arith.constant dense<0.000000e+00> : vector<16x32xf32>
    %65 = tpu.matmul %62, %64, %cst_55 {dimension_numbers = #tpu.dot_dimension_numbers<[1], [0], [0], [1], [0, 0, 1, 1], [], []>} : vector<16x32xbf16>, vector<32x32xbf16>, vector<16x32xf32> -> vector<16x32xf32>
    %66 = arith.addf %61, %65 : vector<16x32xf32>
    %67 = arith.mulf %0, %4 : vector<16x32xf32>
    %68 = arith.truncf %67 : vector<16x32xf32> to vector<16x32xbf16>
    %c2_56 = arith.constant 2 : index
    %c0_57 = arith.constant 0 : index
    %c0_58 = arith.constant 0 : index
    %69 = vector.load %arg8[%c2_56, %c0_57, %c0_58] : memref<3x32x32xbf16, #tpu.memory_space<vmem>>, vector<1x32x32xbf16>
    %70 = vector.shape_cast %69 : vector<1x32x32xbf16> to vector<32x32xbf16>
    %cst_59 = arith.constant dense<0.000000e+00> : vector<16x32xf32>
    %71 = tpu.matmul %68, %70, %cst_59 {dimension_numbers = #tpu.dot_dimension_numbers<[1], [0], [0], [1], [0, 0, 1, 1], [], []>} : vector<16x32xbf16>, vector<32x32xbf16>, vector<16x32xf32> -> vector<16x32xf32>
    %72 = arith.addf %66, %71 : vector<16x32xf32>
    %c2_60 = arith.constant 2 : index
    %c0_61 = arith.constant 0 : index
    %c0_62 = arith.constant 0 : index
    %73 = vector.load %arg10[%c2_60, %c0_61, %c0_62] : memref<3x1x32xf32, #tpu.memory_space<vmem>>, vector<1x1x32xf32>
    %74 = vector.shape_cast %73 : vector<1x1x32xf32> to vector<1x32xf32>
    %75 = vector.broadcast %74 : vector<1x32xf32> to vector<16x32xf32>
    %76 = arith.addf %72, %75 : vector<16x32xf32>
    %cst_63 = arith.constant 0.000000e+00 : f32
    %77 = vector.broadcast %cst_63 : f32 to vector<16x32xf32>
    %78 = arith.maximumf %76, %77 : vector<16x32xf32>
    %79 = arith.truncf %78 : vector<16x32xf32> to vector<16x32xbf16>
    %c2_64 = arith.constant 2 : index
    %c0_65 = arith.constant 0 : index
    %c0_66 = arith.constant 0 : index
    %80 = vector.load %arg9[%c2_64, %c0_65, %c0_66] : memref<3x32x128xbf16, #tpu.memory_space<vmem>>, vector<1x32x128xbf16>
    %81 = vector.shape_cast %80 : vector<1x32x128xbf16> to vector<32x128xbf16>
    %cst_67 = arith.constant dense<0.000000e+00> : vector<16x128xf32>
    %82 = tpu.matmul %79, %81, %cst_67 {dimension_numbers = #tpu.dot_dimension_numbers<[1], [0], [0], [1], [0, 0, 1, 1], [], []>} : vector<16x32xbf16>, vector<32x128xbf16>, vector<16x128xf32> -> vector<16x128xf32>
    %83 = arith.addf %58, %82 : vector<16x128xf32>
    %cst_68 = arith.constant dense<0xFF800000> : vector<16xf32>
    %84 = vector.multi_reduction <maximumf>, %83, %cst_68 [1] : vector<16x128xf32> to vector<16xf32>
    %85 = vector.shape_cast %84 : vector<16xf32> to vector<16x1xf32>
    %86 = vector.broadcast %85 : vector<16x1xf32> to vector<16x128xf32>
    %87 = arith.subf %83, %86 : vector<16x128xf32>
    %88 = math.exp %87 : vector<16x128xf32>
    %cst_69 = arith.constant dense<0.000000e+00> : vector<16xf32>
    %89 = vector.multi_reduction <add>, %88, %cst_69 [1] : vector<16x128xf32> to vector<16xf32>
    %90 = vector.shape_cast %89 : vector<16xf32> to vector<16x1xf32>
    %91 = vector.broadcast %90 : vector<16x1xf32> to vector<16x128xf32>
    %92 = arith.divf %88, %91 : vector<16x128xf32>
    %93 = vector.extract_strided_slice %92 {offsets = [0, 0], sizes = [16, 1], strides = [1, 1]} : vector<16x128xf32> to vector<16x1xf32>
    %94 = vector.broadcast %93 : vector<16x1xf32> to vector<16x32xf32>
    %95 = arith.mulf %2, %94 : vector<16x32xf32>
    %96 = vector.extract_strided_slice %92 {offsets = [0, 1], sizes = [16, 1], strides = [1, 1]} : vector<16x128xf32> to vector<16x1xf32>
    %97 = vector.broadcast %96 : vector<16x1xf32> to vector<16x32xf32>
    %98 = arith.mulf %3, %97 : vector<16x32xf32>
    %99 = arith.addf %95, %98 : vector<16x32xf32>
    %100 = vector.extract_strided_slice %92 {offsets = [0, 2], sizes = [16, 1], strides = [1, 1]} : vector<16x128xf32> to vector<16x1xf32>
    %101 = vector.broadcast %100 : vector<16x1xf32> to vector<16x32xf32>
    %102 = arith.mulf %4, %101 : vector<16x32xf32>
    %103 = arith.addf %99, %102 : vector<16x32xf32>
    %c0_70 = arith.constant 0 : index
    %c0_71 = arith.constant 0 : index
    %104 = vector.load %arg12[%c0_70, %c0_71] : memref<16x32xf32, #tpu.memory_space<vmem>>, vector<16x32xf32>
    tpu.vector_store %arg12[%c0_70, %c0_71], %103 {strides = array<i32>} : memref<16x32xf32, #tpu.memory_space<vmem>>, vector<16x32xf32>,
    return
  }
  func.func @transform_0(%arg0: i32) -> (i32, i32) {
    %c0_i32 = arith.constant 0 : i32
    %c0_i32_0 = arith.constant 0 : i32
    return %arg0, %c0_i32 : i32, i32
  }
  func.func @transform_1(%arg0: i32) -> (i32, i32) {
    %c0_i32 = arith.constant 0 : i32
    %c0_i32_0 = arith.constant 0 : i32
    return %arg0, %c0_i32 : i32, i32
  }
  func.func @transform_2(%arg0: i32) -> (i32, i32) {
    %c0_i32 = arith.constant 0 : i32
    %c0_i32_0 = arith.constant 0 : i32
    return %arg0, %c0_i32 : i32, i32
  }
  func.func @transform_3(%arg0: i32) -> (i32, i32) {
    %c0_i32 = arith.constant 0 : i32
    %c0_i32_0 = arith.constant 0 : i32
    return %arg0, %c0_i32 : i32, i32
  }
  func.func @transform_4(%arg0: i32) -> (i32, i32) {
    %c0_i32 = arith.constant 0 : i32
    %c0_i32_0 = arith.constant 0 : i32
    return %arg0, %c0_i32 : i32, i32
  }
  func.func @transform_5(%arg0: i32) -> (i32, i32, i32) {
    %c0_i32 = arith.constant 0 : i32
    %c0_i32_0 = arith.constant 0 : i32
    %c0_i32_1 = arith.constant 0 : i32
    %c0_i32_2 = arith.constant 0 : i32
    return %c0_i32, %c0_i32_0, %c0_i32_1 : i32, i32, i32
  }
  func.func @transform_6(%arg0: i32) -> (i32, i32, i32) {
    %c0_i32 = arith.constant 0 : i32
    %c0_i32_0 = arith.constant 0 : i32
    %c0_i32_1 = arith.constant 0 : i32
    %c0_i32_2 = arith.constant 0 : i32
    return %c0_i32, %c0_i32_0, %c0_i32_1 : i32, i32, i32
  }
  func.func @transform_7(%arg0: i32) -> (i32, i32, i32) {
    %c0_i32 = arith.constant 0 : i32
    %c0_i32_0 = arith.constant 0 : i32
    %c0_i32_1 = arith.constant 0 : i32
    %c0_i32_2 = arith.constant 0 : i32
    return %c0_i32, %c0_i32_0, %c0_i32_1 : i32, i32, i32
  }
  func.func @transform_8(%arg0: i32) -> (i32, i32, i32) {
    %c0_i32 = arith.constant 0 : i32
    %c0_i32_0 = arith.constant 0 : i32
    %c0_i32_1 = arith.constant 0 : i32
    %c0_i32_2 = arith.constant 0 : i32
    return %c0_i32, %c0_i32_0, %c0_i32_1 : i32, i32, i32
  }
  func.func @transform_9(%arg0: i32) -> (i32, i32, i32) {
    %c0_i32 = arith.constant 0 : i32
    %c0_i32_0 = arith.constant 0 : i32
    %c0_i32_1 = arith.constant 0 : i32
    %c0_i32_2 = arith.constant 0 : i32
    return %c0_i32, %c0_i32_0, %c0_i32_1 : i32, i32, i32
  }
  func.func @transform_10(%arg0: i32) -> (i32, i32) {
    %c0_i32 = arith.constant 0 : i32
    %c0_i32_0 = arith.constant 0 : i32
    %c0_i32_1 = arith.constant 0 : i32
    return %c0_i32, %c0_i32_0 : i32, i32
  }
  func.func @transform_11(%arg0: i32) -> (i32, i32) {
    %c0_i32 = arith.constant 0 : i32
    %c0_i32_0 = arith.constant 0 : i32
    return %arg0, %c0_i32 : i32, i32
  }
}

</mosaic_0001>

<bundles_post_ra>
// kernel: tpu_custom_call.1
= control target key start
LH: loop header
LB: loop body
LE: loop exit
PB: predicated region body
PF: predicated region fallthrough
CT: control target
= control target key end

     0   :  { %16 = vsyncpa [#allocation3], 0  ;;  %s1748_s0 = inlined_call_operand.hbm [shape: f32[16,32], index: 0, kind: input, shape index: {}]   ;;  %s1749_s1 = inlined_call_operand.hbm [shape: f32[16,32], index: 1, kind: input, shape index: {}]   ;;  %s1750_s2 = inlined_call_operand.hbm [shape: f32[16,32], index: 2, kind: input, shape index: {}]   ;;  %s1751_s3 = inlined_call_operand.hbm [shape: f32[16,32], index: 3, kind: input, shape index: {}]   ;;  %s1752_s4 = inlined_call_operand.hbm [shape: f32[16,128], index: 4, kind: input, shape index: {}]   ;;  %s1753_s5 = inlined_call_operand.hbm [shape: bf16[3,32,32], index: 5, kind: input, shape index: {}]   ;;  %s1754_s6 = inlined_call_operand.hbm [shape: bf16[3,32,32], index: 6, kind: input, shape index: {}]   ;;  %s1755_s7 = inlined_call_operand.hbm [shape: bf16[3,32,32], index: 7, kind: input, shape index: {}]   ;;  %s1756_s8 = inlined_call_operand.hbm [shape: bf16[3,32,128], index: 8, kind: input, shape index: {}]   ;;  %s1757_s9 = inlined_call_operand.vmem [shape: f32[3,1,32], index: 9, kind: input, shape index: {}]   ;;  %s1758_s10 = inlined_call_operand.vmem [shape: f32[1,128], index: 10, kind: input, shape index: {}]   ;;  %s1759_s11 = inlined_call_operand.hbm [shape: f32[16,32], index: 11, kind: output, shape index: {}]  }
   0x1   :  { %17 = vsyncpa [#allocation6], 0 }
   0x2   :  { %18 = vsyncpa [#allocation9], 0 }
   0x3   :  { %19 = vsyncpa [#allocation12], 0 }
   0x4   :  { %20 = vsyncpa [#allocation15], 0 }
   0x5   :  { %21 = vsyncpa [#allocation4], 0  ;;  %s1488_s17 = smov [#allocation5]   ;;  %s1489_s19 = smov [#allocation8]  }
   0x6   :  { %s39_s18 = sshll.u32 %s1488_s17, 4  ;;  %s63_s20 = sshll.u32 %s1489_s19, 4  ;;  %s40_s18 = int_to_ptr.vmem [resolvable:$true] %s39_s18  ;;  %s64_s20 = int_to_ptr.vmem [resolvable:$true] %s63_s20 }
   0x7   :  { %s1284_s21 = scalar_lea.vmem %s40_s18, 256  ;;  %p1289_p1 = scmp.lt.s32.totalorder %s40_s18, %s40_s18 }
   0x8   :  { %p1285_p0 = scmp.ne.s32.totalorder %s40_s18, %s1284_s21  ;;  %p1290_p2 = scmp.lt.s32.totalorder %s1284_s21, %s1284_s21 }
   0xa   :  { %p1291_p3 = por %p1290_p2, %p1289_p1 }
   0xc   :  { %p1292_p4 = pnand %p1291_p3, %p1285_p0 }
   0xe   :  { %1295 = shalt.err (!%p1292_p4)
}
   0xf   :  { %s1490_s22 = smov 128   ;;  %s1491_s23 = smov 8  }
  0x10   :  { %45 = dma.hbm_to_vmem [thread:$0]  %s1749_s1, 256, %s40_s18, [#allocation6], %s1490_s22, %s1490_s22, %s1491_s23  }
  0x11   :  { %s1304_s26 = scalar_lea.vmem %s64_s20, 256  ;;  %p1309_p6 = scmp.lt.s32.totalorder %s64_s20, %s64_s20 }
  0x12   :  { %p1305_p5 = scmp.ne.s32.totalorder %s64_s20, %s1304_s26  ;;  %p1310_p7 = scmp.lt.s32.totalorder %s1304_s26, %s1304_s26 }
  0x14   :  { %p1311_p8 = por %p1310_p7, %p1309_p6 }
  0x16   :  { %p1312_p9 = pnand %p1311_p8, %p1305_p5 }
  0x18   :  { %1315 = shalt.err (!%p1312_p9)
}
  0x19   :  { %69 = dma.hbm_to_vmem [thread:$0]  %s1751_s3, 256, %s64_s20, [#allocation9], %s1490_s22, %s1490_s22, %s1491_s23  }
  0x1a   :  { %s1492_s29 = smov [#allocation11]  }
  0x1b   :  { %s87_s30 = sshll.u32 %s1492_s29, 4  ;;  %s88_s30 = int_to_ptr.vmem [resolvable:$true] %s87_s30 }
  0x1c   :  { %s1324_s12 = scalar_lea.vmem %s88_s30, 768  ;;  %p1329_p11 = scmp.lt.s32.totalorder %s88_s30, %s88_s30 }
  0x1d   :  { %p1325_p10 = scmp.ne.s32.totalorder %s88_s30, %s1324_s12  ;;  %p1330_p12 = scmp.lt.s32.totalorder %s1324_s12, %s1324_s12 }
  0x1f   :  { %p1331_p13 = por %p1330_p12, %p1329_p11 }
  0x21   :  { %p1332_p0 = pnand %p1331_p13, %p1325_p10 }
  0x23   :  { %1335 = shalt.err (!%p1332_p0)
}
  0x24   :  { %s1493_s1 = smov 64   ;;  %s1494_s13 = smov 4  }
  0x25   :  { %93 = dma.hbm_to_vmem [thread:$0]  %s1753_s5, 768, %s88_s30, [#allocation12], %s1493_s1, %s1493_s1, %s1494_s13  }
  0x26   :  { %s1495_s3 = smov [#allocation14]   ;;  %s1496_s17 = smov [#allocation2]  }
  0x27   :  { %s111_s16 = sshll.u32 %s1495_s3, 4  ;;  %s27_s18 = sshll.u32 %s1496_s17, 4  ;;  %s112_s16 = int_to_ptr.vmem [resolvable:$true] %s111_s16  ;;  %s28_s18 = int_to_ptr.vmem [resolvable:$true] %s27_s18 }
  0x28   :  { %s1344_s19 = scalar_lea.vmem %s112_s16, 768  ;;  %p1349_p2 = scmp.lt.s32.totalorder %s112_s16, %s112_s16 }
  0x29   :  { %p1345_p1 = scmp.ne.s32.totalorder %s112_s16, %s1344_s19  ;;  %p1350_p3 = scmp.lt.s32.totalorder %s1344_s19, %s1344_s19 }
  0x2b   :  { %p1351_p4 = por %p1350_p3, %p1349_p2 }
  0x2d   :  { %p1352_p5 = pnand %p1351_p4, %p1345_p1 }
  0x2f   :  { %1355 = shalt.err (!%p1352_p5)
}
  0x30   :  { %117 = dma.hbm_to_vmem [thread:$0]  %s1755_s7, 768, %s112_s16, [#allocation15], %s1493_s1, %s1493_s1, %s1494_s13  }
  0x31   :  { %s1364_s5 = scalar_lea.vmem %s28_s18, 256  ;;  %p1369_p7 = scmp.lt.s32.totalorder %s28_s18, %s28_s18 }
  0x32   :  { %p1365_p6 = scmp.ne.s32.totalorder %s28_s18, %s1364_s5  ;;  %p1370_p8 = scmp.lt.s32.totalorder %s1364_s5, %s1364_s5 }
  0x34   :  { %p1371_p9 = por %p1370_p8, %p1369_p7 }
  0x36   :  { %p1372_p10 = pnand %p1371_p9, %p1365_p6 }
  0x38   :  { %1375 = shalt.err (!%p1372_p10)
}
  0x39   :  { %33 = dma.hbm_to_vmem [thread:$0]  %s1748_s0, 256, %s28_s18, [#allocation3], %s1490_s22, %s1490_s22, %s1491_s23  }
  0x3a   :  { %s1497_s26 = smov [#allocation7]   ;;  %s1498_s28 = smov [#allocation10]  }
  0x3b   :  { %s51_s27 = sshll.u32 %s1497_s26, 4  ;;  %s75_s7 = sshll.u32 %s1498_s28, 4  ;;  %s52_s27 = int_to_ptr.vmem [resolvable:$true] %s51_s27  ;;  %s76_s7 = int_to_ptr.vmem [resolvable:$true] %s75_s7 }
  0x3c   :  { %s1384_s29 = scalar_lea.vmem %s52_s27, 256  ;;  %p1389_p12 = scmp.lt.s32.totalorder %s52_s27, %s52_s27 }
  0x3d   :  { %p1385_p11 = scmp.ne.s32.totalorder %s52_s27, %s1384_s29  ;;  %p1390_p13 = scmp.lt.s32.totalorder %s1384_s29, %s1384_s29 }
  0x3f   :  { %p1391_p0 = por %p1390_p13, %p1389_p12 }
  0x41   :  { %p1392_p1 = pnand %p1391_p0, %p1385_p11 }
  0x43   :  { %1395 = shalt.err (!%p1392_p1)
}
  0x44   :  { %57 = dma.hbm_to_vmem [thread:$0]  %s1750_s2, 256, %s52_s27, [#allocation6], %s1490_s22, %s1490_s22, %s1491_s23  }
  0x45   :  { %s1404_s0 = scalar_lea.vmem %s76_s7, 256  ;;  %p1409_p3 = scmp.lt.s32.totalorder %s76_s7, %s76_s7 }
  0x46   :  { %p1405_p2 = scmp.ne.s32.totalorder %s76_s7, %s1404_s0  ;;  %p1410_p4 = scmp.lt.s32.totalorder %s1404_s0, %s1404_s0 }
  0x48   :  { %p1411_p5 = por %p1410_p4, %p1409_p3 }
  0x4a   :  { %p1412_p6 = pnand %p1411_p5, %p1405_p2 }
  0x4c   :  { %1415 = shalt.err (!%p1412_p6)
}
  0x4d   :  { %81 = dma.hbm_to_vmem [thread:$0]  %s1752_s4, 256, %s76_s7, [#allocation9], %s1490_s22, %s1490_s22, %s1491_s23  }
  0x4e   :  { %s1499_s3 = smov [#allocation13]   ;;  %s1500_s17 = smov [#allocation16]  }
  0x4f   :  { %s99_s16 = sshll.u32 %s1499_s3, 4  ;;  %s123_s2 = sshll.u32 %s1500_s17, 4  ;;  %s100_s16 = int_to_ptr.vmem [resolvable:$true] %s99_s16  ;;  %s124_s2 = int_to_ptr.vmem [resolvable:$true] %s123_s2 }
  0x50   :  { %s1424_s18 = scalar_lea.vmem %s100_s16, 768  ;;  %p1429_p8 = scmp.lt.s32.totalorder %s100_s16, %s100_s16 }
  0x51   :  { %p1425_p7 = scmp.ne.s32.totalorder %s100_s16, %s1424_s18  ;;  %p1430_p9 = scmp.lt.s32.totalorder %s1424_s18, %s1424_s18 }
  0x53   :  { %p1431_p10 = por %p1430_p9, %p1429_p8 }
  0x55   :  { %p1432_p11 = pnand %p1431_p10, %p1425_p7 }
  0x57   :  { %1435 = shalt.err (!%p1432_p11)
}
  0x58   :  { %105 = dma.hbm_to_vmem [thread:$0]  %s1754_s6, 768, %s100_s16, [#allocation12], %s1493_s1, %s1493_s1, %s1494_s13  }
  0x59   :  { %s1444_s4 = scalar_lea.vmem %s124_s2, 768  ;;  %p1449_p13 = scmp.lt.s32.totalorder %s124_s2, %s124_s2 }
  0x5a   :  { %p1445_p12 = scmp.ne.s32.totalorder %s124_s2, %s1444_s4  ;;  %p1450_p0 = scmp.lt.s32.totalorder %s1444_s4, %s1444_s4 }
  0x5c   :  { %p1451_p1 = por %p1450_p0, %p1449_p13 }
  0x5e   :  { %p1452_p2 = pnand %p1451_p1, %p1445_p12 }
  0x60   :  { %1455 = shalt.err (!%p1452_p2)
}
  0x61   :  { %129 = dma.hbm_to_vmem [thread:$0]  %s1756_s8, 768, %s124_s2, [#allocation15], %s1493_s1, %s1493_s1, %s1494_s13  }
  0x62   :  { %1476 = dma.done.wait [#allocation3], 256  }
  0x63   :  { %1477 = vsyncadd [#allocation3], 4294967040 }
  0x64   :  { %1478 = dma.done.wait [#allocation6], 512  }
  0x65   :  { %1479 = vsyncadd [#allocation6], 4294966784 }
  0x66   :  { %1480 = dma.done.wait [#allocation9], 512  }
  0x67   :  { %1481 = vsyncadd [#allocation9], 4294966784 }
  0x68   :  { %1482 = dma.done.wait [#allocation12], 1536  }
  0x69   :  { %1483 = vsyncadd [#allocation12], 4294965760 }
  0x6a   :  { %1484 = dma.done.wait [#allocation15], 1536  }
  0x6b   :  { %1485 = vsyncadd [#allocation15], 4294965760  ;;  %v1501_v0 = vmov 0.0   ;;  %vm1502_vm0 = vmmov 0   ;;  %v1244_v1 = vld [vmem:[#allocation13 + $0x8] sm:$0xff]   ;;  %v1245_v2 = vld [vmem:[#allocation11 + $0x8] sm:$0xff]  }
  0x6c   :  { %1122 = vmatprep.subr.bf16.mxu0 %v1501_v0  ;;  %1130 = vmatprep.subr.bf16.mxu1 %v1501_v0  ;;  %v1246_v3 = vld [vmem:[#allocation13] sm:$0xff]   ;;  %v1247_v4 = vld [vmem:[#allocation11] sm:$0xff]   ;;  %v1631_v6 = vld [vmem:[#allocation5 + $0x8] sm:$0xff]  ;;  %vm203_vm1 = vcmask 261120  }
  0x6d   :  { %1126 = vmatprep.mubr.msk.bf16.mxu0 %vm1502_vm0, %v1501_v0  ;;  %1134 = vmatprep.mubr.msk.bf16.mxu1 %vm1502_vm0, %v1501_v0  ;;  %v1629_v5 = vld [vmem:[#allocation5] sm:$0xff]  ;;  %v1633_v7 = vld [vmem:[#allocation2] sm:$0xff]  ;;  %v1637_v9 = vld [vmem:[#allocation2 + $0x8] sm:$0xff] }
  0x6e   :  { %1123 = vmatpush3.bf16.msra.mxu0 %v1244_v1  ;;  %1131 = vmatpush3.bf16.msra.mxu1 %v1245_v2  ;;  %v186_v8 = vpack.c.bf16 %v1631_v6, %v1629_v5  ;;  %v1641_v10 = vpack.c.bf16 %v1637_v9, %v1633_v7  ;;  %v1248_v11 = vld [vmem:[#allocation14 + $0x8] sm:$0xff]   ;;  %v1249_v12 = vld [vmem:[#allocation14] sm:$0xff]   ;;  %v304_v13 = vmul.f32 %v1629_v5, %v1633_v7  ;;  %v1251_v17 = vld [vmem:[#allocation16 + $0x8] sm:$0xff]  }
  0x6f   :  { %1124 = vmatprep.subr.bf16.mxu0 %v1501_v0  ;;  %1132 = vmatprep.subr.bf16.mxu1 %v1501_v0  ;;  %v305_v14 = vmul.f32 %v1631_v6, %v1637_v9  ;;  %v1250_v16 = vld [vmem:[#allocation13 + $0x18] sm:$0xff]   ;;  %v1252_v18 = vld [vmem:[#allocation13 + $0x10] sm:$0xff]   ;;  %v1662_v19 = vld [vmem:[#allocation7] sm:$0xff] }
  0x70   :  { %v1664_v20 = vld [vmem:[#allocation7 + $0x8] sm:$0xff]  ;;  %v1253_v22 = vld [vmem:[#allocation16] sm:$0xff]   ;;  %v563_v25 = vmul.f32 %v1662_v19, %v1633_v7  ;;  %v1259_v61 = vld [vmem:[#allocation16 + $0x18] sm:$0xff]  }
  0x71   :  { %v306_v15 = vpack.c.bf16 %v305_v14, %v304_v13  ;;  %v448_v21 = vpack.c.bf16 %v1664_v20, %v1662_v19  ;;  %v1254_v23 = vld [vmem:[#allocation14 + $0x18] sm:$0xff]   ;;  %v1256_v24 = vld [vmem:[#allocation14 + $0x10] sm:$0xff]   ;;  %v564_v26 = vmul.f32 %v1664_v20, %v1637_v9  ;;  %v1696_v63 = vld [vmem:[#allocation8] sm:$0xff] }
  0x72   :  { %1125 = vmatpush3.bf16.msra.mxu0 %v1246_v3  ;;  %1133 = vmatpush3.bf16.msra.mxu1 %v1247_v4  ;;  %v1054_v39 = vld [vmem:[%s1757_s9] ss:$0 sm:$0xff]  ;;  %v1255_v49 = vld [vmem:[#allocation11 + $0x18] sm:$0xff]   ;;  %v1698_v1 = vld [vmem:[#allocation8 + $0x8] sm:$0xff] }
  0x73   :  { %1138 = vmatprep.subr.bf16.mxu0 %v1501_v0  ;;  %1146 = vmatprep.subr.bf16.mxu1 %v1501_v0  ;;  %v565_v27 = vpack.c.bf16 %v564_v26, %v563_v25  ;;  %v1257_v51 = vld [vmem:[#allocation11 + $0x10] sm:$0xff]   ;;  %v1258_v60 = vld [vmem:[#allocation13 + $0x28] sm:$0xff]   ;;  %v710_v2 = vpack.c.bf16 %v1698_v1, %v1696_v63  ;;  %v1261_v3 = vld [vmem:[#allocation16 + $0x10] sm:$0xff]  }
  0x74   :  { %v1260_v62 = vld [vmem:[#allocation13 + $0x20] sm:$0xff]   ;;  %v1262_v4 = vld [vmem:[#allocation14 + $0x28] sm:$0xff]  }
  0x75   :  { %1127 = vmatmul.mubr.msk.bf16.vlgmr.msra.gmra.mxu0 %vm203_vm1, %v186_v8  ;;  %1135 = vmatmul.mubr.msk.bf16.vlgmr.msra.gmra.mxu1 %vm203_vm1, %v1641_v10  ;;  %v1264_v8 = vld [vmem:[#allocation14 + $0x20] sm:$0xff]  }
  0x76   :  { %1139 = vmatpush3.bf16.msra.mxu0 %v1248_v11  ;;  %1142 = vmatprep.mubr.msk.bf16.mxu0 %vm1502_vm0, %v1501_v0  ;;  %v825_v11 = vmul.f32 %v1696_v63, %v1633_v7 }
  0x77   :  { %1140 = vmatprep.subr.bf16.mxu0 %v1501_v0  ;;  %1150 = vmatprep.mubr.msk.bf16.mxu1 %vm1502_vm0, %v1501_v0 }
  0x78   :  { %1147 = vmatpush3.bf16.msra.mxu1 %v1251_v17 }
  0x79   :  { %1148 = vmatprep.subr.bf16.mxu1 %v1501_v0 }
  0x7a   :  { %1141 = vmatpush3.bf16.msra.mxu0 %v1249_v12  ;;  %v826_v12 = vmul.f32 %v1698_v1, %v1637_v9 }
  0x7b   :  { %1154 = vmatprep.subr.bf16.mxu0 %v1501_v0 }
  0x7c   :  { %1149 = vmatpush3.bf16.msra.mxu1 %v1253_v22  ;;  %v827_v13 = vpack.c.bf16 %v826_v12, %v825_v11 }
  0x7d   :  { %1143 = vmatmul.mubr.msk.bf16.vlgmr.msra.gmra.mxu0 %vm203_vm1, %v306_v15  ;;  %1162 = vmatprep.subr.bf16.mxu1 %v1501_v0 }
  0x7e   :  { %1158 = vmatprep.mubr.msk.bf16.mxu0 %vm1502_vm0, %v1501_v0  ;;  %1155 = vmatpush3.bf16.msra.mxu0 %v1250_v16 }
  0x7f   :  { %1156 = vmatprep.subr.bf16.mxu0 %v1501_v0 }
  0x82   :  { %1157 = vmatpush3.bf16.msra.mxu0 %v1252_v18 }
  0x83   :  { %1170 = vmatprep.subr.bf16.mxu0 %v1501_v0 }
  0x85   :  { %1159 = vmatmul.mubr.msk.bf16.vlgmr.msra.gmra.mxu0 %vm203_vm1, %v448_v21 }
  0x86   :  { %1171 = vmatpush3.bf16.msra.mxu0 %v1254_v23  ;;  %1174 = vmatprep.mubr.msk.bf16.mxu0 %vm1502_vm0, %v1501_v0 }
  0x87   :  { %1172 = vmatprep.subr.bf16.mxu0 %v1501_v0 }
  0x8a   :  { %1173 = vmatpush3.bf16.msra.mxu0 %v1256_v24  ;;  %v1068_v24 = vld [vmem:[%s1757_s9 + $0x1] ss:$0 sm:$0xff] }
  0x8b   :  { %1186 = vmatprep.subr.bf16.mxu0 %v1501_v0 }
  0x8d   :  { %1175 = vmatmul.mubr.msk.bf16.vlgmr.msra.gmra.mxu0 %vm203_vm1, %v565_v27 }
  0x8e   :  { %1190 = vmatprep.mubr.msk.bf16.mxu0 %vm1502_vm0, %v1501_v0  ;;  %1187 = vmatpush3.bf16.msra.mxu0 %v1258_v60 }
  0x8f   :  { %1188 = vmatprep.subr.bf16.mxu0 %v1501_v0 }
  0x92   :  { %1189 = vmatpush3.bf16.msra.mxu0 %v1260_v62 }
  0x93   :  { %1202 = vmatprep.subr.bf16.mxu0 %v1501_v0 }
  0x95   :  { %1191 = vmatmul.mubr.msk.bf16.vlgmr.msra.gmra.mxu0 %vm203_vm1, %v710_v2 }
  0x96   :  { %1203 = vmatpush3.bf16.msra.mxu0 %v1262_v4  ;;  %1206 = vmatprep.mubr.msk.bf16.mxu0 %vm1502_vm0, %v1501_v0 }
  0x97   :  { %1204 = vmatprep.subr.bf16.mxu0 %v1501_v0 }
  0x9a   :  { %1205 = vmatpush3.bf16.msra.mxu0 %v1264_v8 }
  0x9d   :  { %1207 = vmatmul.mubr.msk.bf16.vlgmr.msra.gmra.mxu0 %vm203_vm1, %v827_v13 }
 0x135   :  { %v241_v28 = vpop.f32.mrf.mxu0  ;;  %v297_v29 = vpop.f32.mrf.mxu1 }
 0x136   :  { %v298_v35 = vadd.f32 %v297_v29, %v241_v28 }
 0x137   :  { %v1128_v30 = vpop.f32.mrf.mxu0  ;;  %v1136_v31 = vpop.f32.mrf.mxu1 }
 0x138   :  { %v1263_v31 = vld [vmem:[#allocation11 + $0x28] sm:$0xff]  }
 0x139   :  { %v244_v32 = vpop.f32.mrf.mxu0  ;;  %v300_v33 = vpop.f32.mrf.mxu1 }
 0x13a   :  { %v301_v41 = vadd.f32 %v300_v33, %v244_v32  ;;  %v1265_v33 = vld [vmem:[#allocation11 + $0x20] sm:$0xff]  }
 0x13b   :  { %v1129_v34 = vpop.f32.mrf.mxu0  ;;  %v1137_v36 = vpop.f32.mrf.mxu1 }
 0x13d   :  { %v360_v37 = vpop.f32.mrf.mxu0 }
 0x13e   :  { %v367_v38 = vadd.f32 %v360_v37, %v298_v35 }
 0x13f   :  { %v1144_v40 = vpop.f32.mrf.mxu0 }
 0x140   :  { %v376_v43 = vadd.f32 %v1054_v39, %v367_v38 }
 0x141   :  { %v363_v42 = vpop.f32.mrf.mxu0 }
 0x142   :  { %v368_v44 = vadd.f32 %v363_v42, %v301_v41  ;;  %v378_v47 = vmax.f32 %v376_v43, 0.0  ;;  %v1266_v42 = vld [vmem:[#allocation16 + $0x28] sm:$0xff]   ;;  %v1267_v43 = vld [vmem:[#allocation16 + $0x20] sm:$0xff]  }
 0x143   :  { %v1145_v45 = vpop.f32.mrf.mxu0 }
 0x144   :  { %v377_v46 = vadd.f32 %v1054_v39, %v368_v44  ;;  %v171_v44 = vld [vmem:[#allocation10] sm:$0xff] }
 0x145   :  { %v503_v52 = vpop.f32.mrf.mxu0 }
 0x146   :  { %v379_v48 = vmax.f32 %v377_v46, 0.0  ;;  %v172_v46 = vld [vmem:[#allocation10 + $0x8] sm:$0xff] }
 0x147   :  { %v1160_v53 = vpop.f32.mrf.mxu0 }
 0x148   :  { %v380_v50 = vpack.c.bf16 %v379_v48, %v378_v47 }
 0x149   :  { %v506_v54 = vpop.f32.mrf.mxu0 }
 0x14a   :  { %1151 = vmatmul.mubr.msk.bf16.vlgmr.msra.gmra.mxu1 %vm203_vm1, %v380_v50 }
 0x14b   :  { %1163 = vmatpush3.bf16.msra.mxu1 %v1255_v49  ;;  %1166 = vmatprep.mubr.msk.bf16.mxu1 %vm1502_vm0, %v1501_v0  ;;  %v1161_v55 = vpop.f32.mrf.mxu0 }
 0x14c   :  { %1164 = vmatprep.subr.bf16.mxu1 %v1501_v0 }
 0x14d   :  { %v620_v56 = vpop.f32.mrf.mxu0 }
 0x14f   :  { %1165 = vmatpush3.bf16.msra.mxu1 %v1257_v51  ;;  %v1176_v57 = vpop.f32.mrf.mxu0 }
 0x150   :  { %1178 = vmatprep.subr.bf16.mxu1 %v1501_v0 }
 0x151   :  { %v623_v58 = vpop.f32.mrf.mxu0 }
 0x152   :  { %1167 = vmatmul.mubr.msk.bf16.vlgmr.msra.gmra.mxu1 %vm203_vm1, %v1641_v10 }
 0x153   :  { %1182 = vmatprep.mubr.msk.bf16.mxu1 %vm1502_vm0, %v1501_v0  ;;  %v1177_v59 = vpop.f32.mrf.mxu0  ;;  %1179 = vmatpush3.bf16.msra.mxu1 %v1259_v61 }
 0x154   :  { %1180 = vmatprep.subr.bf16.mxu1 %v1501_v0  ;;  %v1082_v59 = vld [vmem:[%s1757_s9 + $0x2] ss:$0 sm:$0xff]  ;;  %s1506_s9 = smov [#allocation17]  }
 0x155   :  { %v765_v34 = vpop.f32.mrf.mxu0 }
 0x157   :  { %1181 = vmatpush3.bf16.msra.mxu1 %v1261_v3  ;;  %v1192_v35 = vpop.f32.mrf.mxu0 }
 0x158   :  { %1194 = vmatprep.subr.bf16.mxu1 %v1501_v0 }
 0x159   :  { %v768_v36 = vpop.f32.mrf.mxu0 }
 0x15b   :  { %v1193_v37 = vpop.f32.mrf.mxu0 }
 0x15d   :  { %v882_v38 = vpop.f32.mrf.mxu0 }
 0x15f   :  { %v1208_v39 = vpop.f32.mrf.mxu0 }
 0x161   :  { %v885_v40 = vpop.f32.mrf.mxu0 }
 0x163   :  { %v1209_v41 = vpop.f32.mrf.mxu0 }
 0x20a   :  { %v434_v14 = vpop.f32.mrf.mxu1 }
 0x20c   :  { %v1152_v15 = vpop.f32.mrf.mxu1 }
 0x20e   :  { %v437_v16 = vpop.f32.mrf.mxu1 }
 0x210   :  { %v1153_v17 = vpop.f32.mrf.mxu1 }
 0x212   :  { %v556_v18 = vpop.f32.mrf.mxu1 }
 0x213   :  { %v557_v21 = vadd.f32 %v556_v18, %v503_v52 }
 0x214   :  { %v1168_v22 = vpop.f32.mrf.mxu1 }
 0x215   :  { %v627_v23 = vadd.f32 %v620_v56, %v557_v21 }
 0x216   :  { %v559_v7 = vpop.f32.mrf.mxu1 }
 0x217   :  { %v560_v25 = vadd.f32 %v559_v7, %v506_v54  ;;  %v637_v9 = vadd.f32 %v1068_v24, %v627_v23 }
 0x218   :  { %v1169_v26 = vpop.f32.mrf.mxu1 }
 0x219   :  { %v628_v27 = vadd.f32 %v623_v58, %v560_v25  ;;  %v639_v29 = vmax.f32 %v637_v9, 0.0 }
 0x21b   :  { %v638_v28 = vadd.f32 %v1068_v24, %v628_v27  ;;  %v1503_v27 = vmov 1  }
 0x21c   :  { %1238 = vset.pattern.permute.xlu1 %v1503_v27 }
 0x21d   :  { %v640_v30 = vmax.f32 %v638_v28, 0.0  ;;  %v1504_v28 = vmov 0  }
 0x21e   :  { %1237 = vset.pattern.permute.xlu0 %v1504_v28 }
 0x21f   :  { %v641_v32 = vpack.c.bf16 %v640_v30, %v639_v29 }
 0x221   :  { %1183 = vmatmul.mubr.msk.bf16.vlgmr.msra.gmra.mxu1 %vm203_vm1, %v641_v32 }
 0x222   :  { %1195 = vmatpush3.bf16.msra.mxu1 %v1263_v31  ;;  %1198 = vmatprep.mubr.msk.bf16.mxu1 %vm1502_vm0, %v1501_v0 }
 0x223   :  { %1196 = vmatprep.subr.bf16.mxu1 %v1501_v0 }
 0x226   :  { %1197 = vmatpush3.bf16.msra.mxu1 %v1265_v33  ;;  %v1505_v33 = vmov 2  }
 0x227   :  { %1210 = vmatprep.subr.bf16.mxu1 %v1501_v0 }
 0x229   :  { %1199 = vmatmul.mubr.msk.bf16.vlgmr.msra.gmra.mxu1 %vm203_vm1, %v1641_v10  ;;  %v1044_v10 = vld [vmem:[%s1758_s10] ss:$0 sm:$0xff]  ;;  %s1028_s10 = sshll.u32 %s1506_s9, 4  ;;  %s1029_s10 = int_to_ptr.vmem [resolvable:$true] %s1028_s10 }
 0x22a   :  { %1214 = vmatprep.mubr.msk.bf16.mxu1 %vm1502_vm0, %v1501_v0  ;;  %1211 = vmatpush3.bf16.msra.mxu1 %v1266_v42  ;;  %v180_v45 = vadd.f32 %v1044_v10, %v171_v44  ;;  %v181_v48 = vadd.f32 %v1044_v10, %v172_v46  ;;  %s1456_s28 = scalar_lea.vmem %s1029_s10, 256  ;;  %p1461_p4 = scmp.lt.s32.totalorder %s1029_s10, %s1029_s10 }
 0x22b   :  { %1212 = vmatprep.subr.bf16.mxu1 %v1501_v0  ;;  %p1457_p3 = scmp.ne.s32.totalorder %s1029_s10, %s1456_s28  ;;  %p1462_p5 = scmp.lt.s32.totalorder %s1456_s28, %s1456_s28 }
 0x22c   :  { %v441_v47 = vadd.f32 %v434_v14, %v180_v45  ;;  %v442_v52 = vadd.f32 %v437_v16, %v181_v48 }
 0x22d   :  { %p1463_p6 = por %p1462_p5, %p1461_p4 }
 0x22e   :  { %1213 = vmatpush3.bf16.msra.mxu1 %v1267_v43 }
 0x22f   :  { %p1464_p7 = pnand %p1463_p6, %p1457_p3 }
 0x2e1   :  { %v696_v49 = vpop.f32.mrf.mxu1 }
 0x2e2   :  { %v703_v50 = vadd.f32 %v696_v49, %v441_v47 }
 0x2e3   :  { %v1184_v51 = vpop.f32.mrf.mxu1 }
 0x2e5   :  { %v699_v53 = vpop.f32.mrf.mxu1 }
 0x2e6   :  { %v704_v54 = vadd.f32 %v699_v53, %v442_v52 }
 0x2e7   :  { %v1185_v55 = vpop.f32.mrf.mxu1 }
 0x2e9   :  { %v818_v56 = vpop.f32.mrf.mxu1 }
 0x2ea   :  { %v819_v0 = vadd.f32 %v818_v56, %v765_v34 }
 0x2eb   :  { %v1200_v57 = vpop.f32.mrf.mxu1 }
 0x2ec   :  { %v889_v58 = vadd.f32 %v882_v38, %v819_v0 }
 0x2ed   :  { %v821_v60 = vpop.f32.mrf.mxu1 }
 0x2ee   :  { %v822_v61 = vadd.f32 %v821_v60, %v768_v36  ;;  %v899_v2 = vadd.f32 %v1082_v59, %v889_v58 }
 0x2ef   :  { %v1201_v62 = vpop.f32.mrf.mxu1 }
 0x2f0   :  { %v890_v3 = vadd.f32 %v885_v40, %v822_v61  ;;  %v901_v8 = vmax.f32 %v899_v2, 0.0 }
 0x2f2   :  { %v900_v4 = vadd.f32 %v1082_v59, %v890_v3 }
 0x2f4   :  { %v902_v11 = vmax.f32 %v900_v4, 0.0 }
 0x2f6   :  { %v903_v12 = vpack.c.bf16 %v902_v11, %v901_v8 }
 0x2f8   :  { %1215 = vmatmul.mubr.msk.bf16.vlgmr.msra.gmra.mxu1 %vm203_vm1, %v903_v12 }
 0x3b8   :  { %v958_v13 = vpop.f32.mrf.mxu1 }
 0x3b9   :  { %v965_v14 = vadd.f32 %v958_v13, %v703_v50 }
 0x3ba   :  { %v1216_v15 = vpop.f32.mrf.mxu1 }
 0x3bb   :  { %967 = vmax.xlane.f32.xlu0 %v965_v14 }
 0x3bc   :  { %v961_v16 = vpop.f32.mrf.mxu1 }
 0x3bd   :  { %v966_v17 = vadd.f32 %v961_v16, %v704_v54 }
 0x3be   :  { %v1217_v18 = vpop.f32.mrf.mxu1 }
 0x3bf   :  { %969 = vmax.xlane.f32.xlu0 %v966_v17 }
 0x444   :  { %v968_v21 = vpop.xlane.xlu0 %967 }
 0x445   :  { %v971_v22 = vsub.f32 %v965_v14, %v968_v21 }
 0x447   :  { %v973_v23 = vmul.f32 1.442695, %v971_v22 }
 0x448   :  { %v970_v24 = vpop.xlane.xlu0 %969 }
 0x449   :  { %1268 = vpow2.f32 %v973_v23  ;;  %v972_v7 = vsub.f32 %v966_v17, %v970_v24 }
 0x44b   :  { %v975_v25 = vmul.f32 1.442695, %v972_v7 }
 0x44d   :  { %1270 = vpow2.f32 %v975_v25 }
 0x456   :  { %v1269_v26 = vpop.eup %1268 }
 0x457   :  { %977 = vadd.xlane.f32.xlu1 %v1269_v26 }
 0x45a   :  { %v1271_v9 = vpop.eup %1270 }
 0x45b   :  { %979 = vadd.xlane.f32.xlu1 %v1271_v9 }
 0x4e0   :  { %v978_v29 = vpop.xlane.xlu1 %977 }
 0x4e1   :  { %1272 = vrcp.f32 %v978_v29 }
 0x4e4   :  { %v980_v30 = vpop.xlane.xlu1 %979 }
 0x4e5   :  { %1274 = vrcp.f32 %v980_v30 }
 0x4ee   :  { %v1273_v31 = vpop.eup %1272 }
 0x4ef   :  { %v982_v32 = vmul.f32 %v1273_v31, %v1269_v26 }
 0x4f1   :  { %987 = vperm.xlu0 %1237, %v982_v32   ;;  %998 = vperm.xlu1 %1238, %v982_v32  }
 0x4f2   :  { %v1275_v34 = vpop.eup %1274 }
 0x4f3   :  { %v984_v35 = vmul.f32 %v1275_v34, %v1271_v9 }
 0x4f5   :  { %1239 = vset.pattern.permute.xlu1 %v1505_v33  ;;  %1243 = vset.pattern.permute.xlu0 %v1505_v33 }
 0x4f6   :  { %1010 = vperm.xlu1 %1239, %v982_v32  }
 0x4fa   :  { %1240 = vset.pattern.permute.xlu1 %v1504_v28 }
 0x4fb   :  { %992 = vperm.xlu1 %1240, %v984_v35  }
 0x4ff   :  { %1241 = vset.pattern.permute.xlu1 %v1503_v27 }
 0x500   :  { %1002 = vperm.xlu1 %1241, %v984_v35  }
 0x504   :  { %1242 = vset.pattern.permute.xlu1 %v1505_v33 }
 0x505   :  { %1014 = vperm.xlu1 %1242, %v984_v35  }
 0x56c   :  { %v999_v36 = vpop.permute.xlu1 %998  ;;  %v988_v37 = vpop.permute.xlu0 %987 }
 0x56d   :  { %v1005_v38 = vmul.f32 %v999_v36, %v1662_v19  ;;  %v995_v39 = vmul.f32 %v988_v37, %v1629_v5 }
 0x56f   :  { %v1007_v41 = vadd.f32 %v1005_v38, %v995_v39 }
 0x571   :  { %v1011_v40 = vpop.permute.xlu1 %1010 }
 0x572   :  { %v1017_v42 = vmul.f32 %v1011_v40, %v1696_v63 }
 0x574   :  { %v1019_v43 = vadd.f32 %v1017_v42, %v1007_v41 }
 0x576   :  { %1021 = vst.msk [vmem:[#allocation17] sm:$0xff] %vm203_vm1, %v1019_v43  ;;  %v993_v44 = vpop.permute.xlu1 %992 }
 0x577   :  { %v996_v46 = vmul.f32 %v993_v44, %v1631_v6 }
 0x57b   :  { %v1003_v10 = vpop.permute.xlu1 %1002 }
 0x57c   :  { %v1006_v45 = vmul.f32 %v1003_v10, %v1664_v20 }
 0x57e   :  { %v1008_v48 = vadd.f32 %v1006_v45, %v996_v46 }
 0x580   :  { %v1015_v47 = vpop.permute.xlu1 %1014 }
 0x581   :  { %v1018_v19 = vmul.f32 %v1015_v47, %v1698_v1 }
 0x583   :  { %v1020_v5 = vadd.f32 %v1018_v19, %v1008_v48 }
 0x585   :  { %1022 = vst.msk [vmem:[#allocation17 + $0x8] sm:$0xff] %vm203_vm1, %v1020_v5 }
 0x586   :  { %1467 = shalt.err (!%p1464_p7)
}
 0x587   :  { %1034 = dma.vmem_to_hbm [thread:$0]  %s1029_s10, 256, %s1759_s11, [#allocation4], %s1490_s22, %s1490_s22, %s1491_s23  }
 0x588   :  { %1486 = dma.done.wait [#allocation4], 256  }
 0x589   :  { %1487 = vsyncadd [#allocation4], 4294967040 }
 0x58a   :  { %1038 = vsyncpa [#allocation3], 1 }
 0x58b   :  { %1039 = vsyncpa [#allocation6], 1 }
 0x58c   :  { %1040 = vsyncpa [#allocation9], 1 }
 0x58d   :  { %1041 = vsyncpa [#allocation12], 1 }
 0x58e   :  { %1042 = vsyncpa [#allocation15], 1 }
 0x58f   :  { %1043 = vsyncpa [#allocation4], 1 }

</bundles_post_ra>
